<compile_context>
chip_gen: v6e
topology: v6e:2x2x1
jax: 0.10.0
libtpu: 0.0.40
codegen_flags: <defaults>
</compile_context>

<pallas_src>
import math

import jax
import jax.numpy as jnp
from jax.experimental import pallas as pl
from jax.experimental.pallas import tpu as pltpu

# VMEM-safe ceiling for the batch tile (double-buffered x(5,tb)+out(1,tb) f32
# tiles stay ~6 MiB at this cap, far under the scoped-VMEM default everywhere).
_TB_CAP = 128 * 1024


def _round_up(v: int, m: int) -> int:
    return ((v + m - 1) // m) * m


def _num_tensorcores() -> int:
    """Best-effort TensorCore count of the local device (v7x has 2 per chip)."""
    try:
        d = jax.devices()[0]
        kind = (getattr(d, "device_kind", "") or "").lower()
        if "v7" in kind:
            return 2
        return int(getattr(d, "num_cores", 1) or 1)
    except Exception:  # noqa: BLE001 - perf heuristic only, never fail here
        return 1


def _mlp_kernel(x_ref, w1_ref, b1_ref, w2_ref, b2_ref, o_ref):
    # x_ref : (5, TB)   batch tile, batch on lanes, f32
    # w1_ref: (H, 5)    first Linear weight (PyTorch (out, in) layout), f32
    # b1_ref: (H, 1)
    # w2_ref: (H, 1)    second Linear weight as a column
    # b2_ref: (1, 1)    scalar in SMEM
    # o_ref : (1, TB)   lane-dense output tile
    h = jnp.dot(w1_ref[...], x_ref[...],
                preferred_element_type=jnp.float32)          # (H, TB) on MXU, f32
    h = jnp.maximum(h + b1_ref[...], 0.0)                    # bias + ReLU on VPU
    # Second Linear (out width 1): VPU multiply + sublane reduce, no MXU pass.
    out = jnp.sum(h * w2_ref[...], axis=0, keepdims=True)    # (1, TB)
    o_ref[...] = (out + b2_ref[0, 0]).astype(o_ref.dtype)


def evaluation_agent_forward_t(x_t, w1, b1, w2, b2, *, block_b=16384):
    """Pallas forward equivalent to EvaluationAgent.net, transposed input.

    x_t: (5, N) float32  candidate features, batch on the LAST (lane) axis.
         Build your candidate matrix directly in this layout — it avoids a
         whole extra HBM read+write pass for the transpose.
    w1:  (H, 5) float32  first Linear weight (PyTorch (out, in) layout)
    b1:  (H,)   float32
    w2:  (1, H) float32  second Linear weight (PyTorch layout)
    b2:  (1,)   float32
    returns (N, 1) float32 — bit-compatible with the PyTorch f32 forward.
    """
    in_f, n = x_t.shape
    hidden = w1.shape[0]
    assert w1.shape == (hidden, in_f)

    x_t = x_t.astype(jnp.float32)
    b1_c = b1.reshape(hidden, 1).astype(jnp.float32)
    w2_c = w2.reshape(hidden, 1).astype(jnp.float32)   # (1,H)->(H,1): free reshape
    b2_s = b2.reshape(1, 1).astype(jnp.float32)

    # ---- batch tile selection -------------------------------------------
    # Always a multiple of 128 lanes; as big as possible (fewer grid steps ->
    # less fixed per-step overhead), capped for VMEM safety.  On multi-TC
    # chips (v7x) cap the tile so large batches get >= num_tc grid steps and
    # both cores are fed; on v5e/v6e a single step is optimal for small N.
    n128 = _round_up(max(n, 1), 128)
    block_b = min(max(_round_up(block_b, 128), 128), _TB_CAP)
    num_tc = _num_tensorcores()
    if num_tc > 1:
        per_core = _round_up(pl.cdiv(n128, num_tc), 128)
        tb = min(block_b, per_core)
    else:
        tb = min(block_b, n128)
    tb = max(tb, 128)

    n_pad = pl.cdiv(n, tb) * tb
    if n_pad != n:
        # Padded columns compute relu(b1)*w2 + b2 (garbage) and are sliced off
        # in the epilogue below — callers never see them.
        x_t = jnp.pad(x_t, ((0, 0), (0, n_pad - n)))

    grid = (n_pad // tb,)

    flops = n_pad * (2 * in_f * hidden + 4 * hidden + 1)
    bytes_accessed = 4 * (in_f * n_pad + n_pad + hidden * (in_f + 2) + 1)

    out_t = pl.pallas_call(
        _mlp_kernel,
        out_shape=jax.ShapeDtypeStruct((1, n_pad), jnp.float32),
        grid=grid,
        in_specs=[
            pl.BlockSpec((in_f, tb), lambda i: (0, i)),          # x^T batch tile
            pl.BlockSpec((hidden, in_f), lambda i: (0, 0)),      # W1, VMEM-resident
            pl.BlockSpec((hidden, 1), lambda i: (0, 0)),         # b1, VMEM-resident
            pl.BlockSpec((hidden, 1), lambda i: (0, 0)),         # w2, VMEM-resident
            pl.BlockSpec(memory_space=pltpu.MemorySpace.SMEM),   # b2 scalar in SMEM
        ],
        out_specs=pl.BlockSpec((1, tb), lambda i: (0, i)),       # lane-dense output
        compiler_params=pltpu.CompilerParams(
            dimension_semantics=("parallel",)),
        cost_estimate=pl.CostEstimate(
            flops=flops, transcendentals=0, bytes_accessed=bytes_accessed),
    )(x_t, w1.astype(jnp.float32), b1_c, w2_c, b2_s)

    # (1, n_pad) -> (N, 1). Zero-copy reshape when no padding; otherwise slice
    # the padded tail first.
    if n_pad == n:
        return out_t.reshape(n, 1)
    return out_t[:, :n].reshape(n, 1)


def evaluation_agent_forward(x, w1, b1, w2, b2, *, block_b=16384):
    """Convenience wrapper for (N, 5)-layout callers.

    NOTE: the x.T here is a separate XLA op that re-reads/re-writes the whole
    input in HBM.  Prefer building features directly in (5, N) layout and
    calling evaluation_agent_forward_t.
    """
    return evaluation_agent_forward_t(x.T, w1, b1, w2, b2, block_b=block_b)


def init_params(key, in_features=5, hidden_size=20, out_features=1):
    """Deterministic init mimicking PyTorch nn.Linear defaults (uniform +-1/sqrt(fan_in)),
    returned in PyTorch layouts: w (out, in), b (out,)."""
    k1, k2, k3, k4 = jax.random.split(key, 4)
    bound1 = 1.0 / math.sqrt(in_features)
    bound2 = 1.0 / math.sqrt(hidden_size)
    w1 = jax.random.uniform(k1, (hidden_size, in_features), jnp.float32,
                            minval=-bound1, maxval=bound1)
    b1 = jax.random.uniform(k2, (hidden_size,), jnp.float32,
                            minval=-bound1, maxval=bound1)
    w2 = jax.random.uniform(k3, (out_features, hidden_size), jnp.float32,
                            minval=-bound2, maxval=bound2)
    b2 = jax.random.uniform(k4, (out_features,), jnp.float32,
                            minval=-bound2, maxval=bound2)
    return w1, b1, w2, b2


def _f32_reference(x, w1, b1, w2, b2):
    """Exact f32 PyTorch-equivalent forward: relu(x @ W1^T + b1) @ W2^T + b2."""
    return jnp.maximum(x @ w1.T + b1, 0.0) @ w2.T + b2


if __name__ == "__main__":
    key = jax.random.PRNGKey(0)
    k_params, k_x1, k_x2 = jax.random.split(key, 3)

    IN, HIDDEN = 5, 20
    w1, b1, w2, b2 = init_params(k_params, IN, HIDDEN, 1)

    # --- Case 1: typical best_move batch (4 rotations x 10 columns = 40
    # candidate boards), built DIRECTLY in (5, N) lane-dense layout so the
    # kernel is the only tensor op (no transpose pass).  Single grid step.
    B1 = 40
    x_t1 = jax.random.normal(k_x1, (IN, B1), dtype=jnp.float32)
    out1 = evaluation_agent_forward_t(x_t1, w1, b1, w2, b2)
    out1 = jax.block_until_ready(out1)
    assert out1.shape == (B1, 1)
    ref1 = _f32_reference(x_t1.T, w1, b1, w2, b2)
    assert jnp.allclose(out1, ref1, atol=1e-4, rtol=1e-4), "case 1 mismatch"

    # --- Case 2: larger batch via the (N, 5) convenience wrapper with a small
    # forced tile (block_b=128 -> multiple grid steps + tail padding) to
    # exercise the pipeline, weight residency and the padded-tail slice path.
    B2 = 300
    x2 = jax.random.normal(k_x2, (B2, IN), dtype=jnp.float32)
    out2 = evaluation_agent_forward(x2, w1, b1, w2, b2, block_b=128)
    out2 = jax.block_until_ready(out2)
    assert out2.shape == (B2, 1)
    ref2 = _f32_reference(x2, w1, b1, w2, b2)
    assert jnp.allclose(out2, ref2, atol=1e-4, rtol=1e-4), "case 2 mismatch"

    # TODO(synk): best_move/act/_board_features/_simulate_move, the Adam/SmoothL1
    # update, and TorchScript save/load are host-side Python game logic / training /
    # IO with no tensor hot path; only forward() is kernelized — callers should
    # stack all candidate boards' features (ideally already in (5, N) layout) and
    # call evaluation_agent_forward_t once.
    print("KERNEL_OK")
</pallas_src>

<mosaic_0001>
module attributes {stable_mosaic.version = 11 : i64} {
  func.func @_mlp_kernel(%arg0: i32, %arg1: memref<5x128xf32, #tpu.memory_space<vmem>>, %arg2: memref<20x5xf32, #tpu.memory_space<vmem>>, %arg3: memref<20x1xf32, #tpu.memory_space<vmem>>, %arg4: memref<20x1xf32, #tpu.memory_space<vmem>>, %arg5: memref<1x1xf32, #tpu.memory_space<smem>>, %arg6: memref<1x128xf32, #tpu.memory_space<vmem>>) attributes {dimension_semantics = [#tpu.dimension_semantics<parallel>], iteration_bounds = array<i64: 1>, scalar_prefetch = 0 : i64, scratch_operands = 0 : i64, tpu.core_type = #tpu.core_type<tc>, window_params = [{transform_indices = @transform_0, window_bounds = array<i64: 5, 128>}, {pipeline_mode = #tpu.pipeline_mode<synchronous>, transform_indices = @transform_1, window_bounds = array<i64: 20, 5>}, {pipeline_mode = #tpu.pipeline_mode<synchronous>, transform_indices = @transform_2, window_bounds = array<i64: 20, 1>}, {pipeline_mode = #tpu.pipeline_mode<synchronous>, transform_indices = @transform_3, window_bounds = array<i64: 20, 1>}, {transform_indices = @transform_4, window_bounds = array<i64: 1, 1>}, {transform_indices = @transform_5, window_bounds = array<i64: 1, 128>}]} {
    %c0 = arith.constant 0 : index
    %c0_0 = arith.constant 0 : index
    %0 = vector.load %arg2[%c0, %c0_0] : memref<20x5xf32, #tpu.memory_space<vmem>>, vector<20x5xf32>
    %c0_1 = arith.constant 0 : index
    %c0_2 = arith.constant 0 : index
    %1 = vector.load %arg1[%c0_1, %c0_2] : memref<5x128xf32, #tpu.memory_space<vmem>>, vector<5x128xf32>
    %cst = arith.constant dense<0.000000e+00> : vector<20x128xf32>
    %2 = tpu.matmul %0, %1, %cst {dimension_numbers = #tpu.dot_dimension_numbers<[1], [0], [0], [1], [0, 0, 1, 1], [], []>} : vector<20x5xf32>, vector<5x128xf32>, vector<20x128xf32> -> vector<20x128xf32>
    %c0_3 = arith.constant 0 : index
    %c0_4 = arith.constant 0 : index
    %3 = vector.load %arg3[%c0_3, %c0_4] : memref<20x1xf32, #tpu.memory_space<vmem>>, vector<20x1xf32>
    %4 = vector.broadcast %3 : vector<20x1xf32> to vector<20x128xf32>
    %5 = arith.addf %2, %4 : vector<20x128xf32>
    %cst_5 = arith.constant 0.000000e+00 : f32
    %6 = vector.broadcast %cst_5 : f32 to vector<20x128xf32>
    %7 = arith.maximumf %5, %6 : vector<20x128xf32>
    %c0_6 = arith.constant 0 : index
    %c0_7 = arith.constant 0 : index
    %8 = vector.load %arg4[%c0_6, %c0_7] : memref<20x1xf32, #tpu.memory_space<vmem>>, vector<20x1xf32>
    %9 = vector.broadcast %8 : vector<20x1xf32> to vector<20x128xf32>
    %10 = arith.mulf %7, %9 : vector<20x128xf32>
    %cst_8 = arith.constant dense<0.000000e+00> : vector<128xf32>
    %11 = vector.multi_reduction <add>, %10, %cst_8 [0] : vector<20x128xf32> to vector<128xf32>
    %12 = vector.shape_cast %11 : vector<128xf32> to vector<1x128xf32>
    %c0_9 = arith.constant 0 : index
    %c0_10 = arith.constant 0 : index
    %13 = memref.load %arg5[%c0_9, %c0_10] : memref<1x1xf32, #tpu.memory_space<smem>>
    %14 = vector.broadcast %13 : f32 to vector<1x128xf32>
    %15 = arith.addf %12, %14 : vector<1x128xf32>
    %c0_11 = arith.constant 0 : index
    %c0_12 = arith.constant 0 : index
    %16 = vector.load %arg6[%c0_11, %c0_12] : memref<1x128xf32, #tpu.memory_space<vmem>>, vector<1x128xf32>
    tpu.vector_store %arg6[%c0_11, %c0_12], %15 {strides = array<i32>} : memref<1x128xf32, #tpu.memory_space<vmem>>, vector<1x128xf32>,
    return
  }
  func.func @transform_0(%arg0: i32) -> (i32, i32) {
    %c0_i32 = arith.constant 0 : i32
    %c0_i32_0 = arith.constant 0 : i32
    return %c0_i32, %arg0 : i32, i32
  }
  func.func @transform_1(%arg0: i32) -> (i32, i32) {
    %c0_i32 = arith.constant 0 : i32
    %c0_i32_0 = arith.constant 0 : i32
    %c0_i32_1 = arith.constant 0 : i32
    return %c0_i32, %c0_i32_0 : i32, i32
  }
  func.func @transform_2(%arg0: i32) -> (i32, i32) {
    %c0_i32 = arith.constant 0 : i32
    %c0_i32_0 = arith.constant 0 : i32
    %c0_i32_1 = arith.constant 0 : i32
    return %c0_i32, %c0_i32_0 : i32, i32
  }
  func.func @transform_3(%arg0: i32) -> (i32, i32) {
    %c0_i32 = arith.constant 0 : i32
    %c0_i32_0 = arith.constant 0 : i32
    %c0_i32_1 = arith.constant 0 : i32
    return %c0_i32, %c0_i32_0 : i32, i32
  }
  func.func @transform_4(%arg0: i32) -> (i32, i32) {
    %c0_i32 = arith.constant 0 : i32
    %c0_i32_0 = arith.constant 0 : i32
    %c0_i32_1 = arith.constant 0 : i32
    return %c0_i32, %c0_i32_0 : i32, i32
  }
  func.func @transform_5(%arg0: i32) -> (i32, i32) {
    %c0_i32 = arith.constant 0 : i32
    %c0_i32_0 = arith.constant 0 : i32
    return %c0_i32, %arg0 : i32, i32
  }
}

</mosaic_0001>

<bundles_post_ra>
// kernel: tpu_custom_call.1
= control target key start
LH: loop header
LB: loop body
LE: loop exit
PB: predicated region body
PF: predicated region fallthrough
CT: control target
= control target key end

     0   :  { %vm54_vm0 = vcmask 1044480   ;;  %v239_v1 = vmov 0.0   ;;  %vm44_vm1 = vcmask 39936   ;;  %vm240_vm2 = vmmov 0   ;;  %s312_s0 = inlined_call_operand.vmem [shape: f32[5,128], index: 0, kind: input, shape index: {}]   ;;  %s313_s1 = inlined_call_operand.vmem [shape: f32[20,5], index: 1, kind: input, shape index: {}]   ;;  %s314_s2 = inlined_call_operand.vmem [shape: f32[20,1], index: 2, kind: input, shape index: {}]   ;;  %s315_s3 = inlined_call_operand.vmem [shape: f32[20,1], index: 3, kind: input, shape index: {}]   ;;  %s316_s4 = inlined_call_operand.<no memory space> [shape: f32[1,1], index: 4, kind: input, shape index: {}]   ;;  %s317_s5 = inlined_call_operand.hbm [shape: f32[1,128], index: 5, kind: output, shape index: {}]  }
   0x1   :  { %v25_v0 = vld [vmem:[%s312_s0] sm:$0x1f]  ;;  %198 = vmatprep.subr.mxu0 %v239_v1  ;;  %209 = vmatprep.subr.mxu1 %v239_v1  ;;  %v23_v3 = vld [vmem:[%s313_s1 + $0x8] sm:$0xff] }
   0x2   :  { %v22_v2 = vld [vmem:[%s313_s1] sm:$0xff]  ;;  %199 = vmatpush3.msk.msra.mxu0 %vm54_vm0, %v25_v0  ;;  %210 = vmatpush3.msk.msra.mxu1 %vm54_vm0, %v25_v0 }
   0x3   :  { %200 = vmatprep.mubr.msk.f32.mxu0 %vm240_vm2, %v239_v1  ;;  %203 = vmatprep.mubr.msk.f32.mxu1 %vm240_vm2, %v239_v1  ;;  %v26_v4 = vld [vmem:[%s314_s2] sm:$0xff] }
   0x4   :  { %11 = vsyncpa [#allocation4], 0  ;;  %201 = vmatmul.mubr.msk.f32.vlgmr.msra.gmra.mxu0 %vm44_vm1, %v22_v2  ;;  %204 = vmatmul.mubr.msk.f32.vlgmr.msra.gmra.mxu1 %vm44_vm1, %v23_v3  ;;  %v28_v5 = vld [vmem:[%s314_s2 + $0x10] sm:$0xf]  ;;  %v241_v7 = vmov 0   ;;  %v27_v8 = vld [vmem:[%s314_s2 + $0x8] sm:$0xff]  ;;  %v173_v41 = vstv %s316_s4 }
   0x5   :  { %206 = vmatprep.mubr.msk.f32.mxu1 %vm240_vm2, %v239_v1  ;;  %v24_v6 = vld [vmem:[%s313_s1 + $0x10] sm:$0xf]  ;;  %215 = vset.pattern.permute.xlu0 %v241_v7  ;;  %v141_v9 = vld [vmem:[%s315_s3] sm:$0xff]  ;;  %v142_v10 = vld [vmem:[%s315_s3 + $0x8] sm:$0xff]  ;;  %vm163_vm3 = vcmask 1043456   ;;  %s242_s11 = smov [#allocation3]  }
   0x6   :  { %216 = vset.pattern.permute.xlu1 %v241_v7  ;;  %31 = vperm.xlu0 %215, %v26_v4   ;;  %v143_v11 = vld [vmem:[%s315_s3 + $0x10] sm:$0xf]  ;;  %s182_s12 = sshll.u32 %s242_s11, 4  ;;  %s183_s12 = int_to_ptr.vmem [resolvable:$true] %s182_s12 }
   0x7   :  { %41 = vperm.xlu1 %216, %v28_v5   ;;  %s217_s13 = scalar_lea.vmem %s183_s12, 16  ;;  %s221_s14 = scalar_lea.vmem %s183_s12, 32 }
   0x8   :  { %207 = vmatmul.mubr.msk.f32.gmra.mxu1 %vm44_vm1, %v24_v6  ;;  %p218_p0 = scmp.ne.s32.totalorder %s183_s12, %s217_s13  ;;  %p222_p1 = scmp.lt.s32.totalorder %s183_s12, %s183_s12 }
   0x9   :  { %p223_p2 = scmp.lt.s32.totalorder %s221_s14, %s217_s13 }
   0xa   :  { %36 = vperm.xlu0 %215, %v27_v8  }
   0xb   :  { %146 = vperm.xlu1 %216, %v141_v9   ;;  %p224_p3 = por %p223_p2, %p222_p1 }
   0xd   :  { %p225_p4 = pnand %p224_p3, %p218_p0 }
   0xe   :  { %151 = vperm.xlu0 %215, %v142_v10  }
   0xf   :  { %156 = vperm.xlu1 %216, %v143_v11  }
  0x81   :  { %v32_v12 = vpop.permute.xlu0 %31 }
  0x82   :  { %v42_v13 = vpop.permute.xlu1 %41 }
  0x85   :  { %v37_v14 = vpop.permute.xlu0 %36 }
  0x86   :  { %v147_v17 = vpop.permute.xlu1 %146 }
  0x89   :  { %v152_v25 = vpop.permute.xlu0 %151 }
  0x8a   :  { %v157_v31 = vpop.permute.xlu1 %156 }
  0xc4   :  { %v124_v15 = vpop.f32.mrf.mxu0  ;;  %v129_v16 = vpop.f32.mrf.mxu1 }
  0xc5   :  { %v125_v18 = vadd.f32 %v124_v15, %v32_v12  ;;  %v130_v19 = vadd.f32 %v129_v16, %v37_v14 }
  0xc6   :  { %v205_v20 = vpop.f32.mrf.mxu1  ;;  %v202_v21 = vpop.f32.mrf.mxu0 }
  0xc7   :  { %v138_v22 = vmax.f32 %v125_v18, 0.0  ;;  %v139_v23 = vmax.f32 %v130_v19, 0.0 }
  0xc8   :  { %v134_v24 = vpop.f32.mrf.mxu1 }
  0xc9   :  { %v135_v26 = vadd.f32 %v134_v24, %v42_v13  ;;  %v159_v27 = vmul.f32 %v147_v17, %v138_v22  ;;  %v160_v28 = vmul.f32 %v152_v25, %v139_v23 }
  0xca   :  { %v208_v29 = vpop.f32.mrf.mxu1 }
  0xcb   :  { %v140_v30 = vmax.f32 %v135_v26, 0.0  ;;  %v162_v33 = vadd.f32 %v160_v28, %v159_v27 }
  0xcd   :  { %v161_v32 = vmul.f32 %v157_v31, %v140_v30 }
  0xcf   :  { %v164_v34 = vsel %vm163_vm3, %v161_v32, 0.0 }
  0xd0   :  { %v165_v35 = vadd.f32 %v164_v34, %v162_v33 }
  0xd2   :  { %v166_v36 = vrot.slane %v165_v35, 4 }
  0xd4   :  { %v167_v37 = vadd.f32 %v166_v36, %v165_v35 }
  0xd6   :  { %v168_v38 = vrot.slane %v167_v37, 2 }
  0xd8   :  { %v169_v39 = vadd.f32 %v168_v38, %v167_v37 }
  0xda   :  { %v170_v40 = vrot.slane %v169_v39, 1 }
  0xdc   :  { %v171_v42 = vadd.f32 %v170_v40, %v169_v39 }
  0xde   :  { %v174_v43 = vadd.f32 %v173_v41, %v171_v42 }
  0xe0   :  { %175 = vst [vmem:[#allocation3] sm:$0x1] %v174_v43 }
  0xe1   :  { %228 = shalt.err (!%p225_p4)
}
  0xe2   :  { %185 = dma.vmem_to_hbm [thread:$0]  %s183_s12, 16, %s317_s5, [#allocation4]  }
  0xe3   :  { %237 = dma.done.wait [#allocation4], 16  }
  0xe4   :  { %238 = vsyncadd [#allocation4], 4294967280 }
  0xe5   :  { %189 = vsyncpa [#allocation4], 1 }

</bundles_post_ra>
